<compile_context>
chip_gen: v7x
topology: tpu7x:2x2x1
jax: 0.10.0
libtpu: 0.0.40
codegen_flags: <defaults>
</compile_context>

<pallas_src>
import jax
import jax.numpy as jnp
from jax.experimental import pallas as pl
from jax.experimental.pallas import tpu as pltpu

EPS = 1e-5  # Python float -> in-kernel literal (not a captured constant)


def conv_block(x_nchw, weight_oihw, stride=1, padding=1):
    """Fused Conv2d(no bias) + BatchNorm2d(training, affine=False) + MaxPool2d(3,1,1).

    x_nchw:      (N, Cin, H, W)      float32 (PyTorch layout)
    weight_oihw: (Cout, Cin, KH, KW) float32 (PyTorch layout)
    returns      (N, Cout, Ho, Wo)   float32
    """
    N, Cin, H, W = x_nchw.shape
    Cout, Cin_w, KH, KW = weight_oihw.shape
    assert Cin == Cin_w
    assert stride == 1, "kernel specialized for stride=1 (module default)"

    Hp, Wp = H + 2 * padding, W + 2 * padding
    Ho = Hp - KH + 1
    Wo = Wp - KW + 1
    L = Wo * Cout                     # lane width of working layout (=128 here)
    NR = N * Ho                       # matmul M / row axis of the working slab
    K = KH * Wp * Cin                 # fused contraction (KH bands folded into K)
    Kp = ((K + 127) // 128) * 128     # pad K -> unmasked lane loads, aligned MXU
    M_total = N * Ho * Wo             # BN reduction size per channel
    # roll-tree BN reduce assumes power-of-2 Wo (else pass an S grouping matrix)
    assert Wo & (Wo - 1) == 0
    wo_log2 = Wo.bit_length() - 1

    # ------------- wrapper-side layout prep (plain XLA, fused under jit) --------
    # input: NCHW -> zero-padded NHWC -> (N, Hp, Wp*Cin)
    x = jnp.transpose(x_nchw, (0, 2, 3, 1)).astype(jnp.float32)
    xp = jnp.pad(x, ((0, 0), (padding, padding), (padding, padding), (0, 0)))
    x2 = xp.reshape(N, Hp, Wp * Cin)

    # LHS: per output row h, concatenate the KH shifted input rows along lanes
    # -> (N*Ho, KH*Wp*Cin), zero-padded to Kp, bf16 for the MXU.
    lhs = jnp.concatenate([x2[:, dy:dy + Ho, :] for dy in range(KH)], axis=-1)
    lhs = lhs.reshape(NR, K)
    lhs = jnp.pad(lhs, ((0, 0), (0, Kp - K))).astype(jnp.bfloat16)

    # Banded weight: B[(dy,wi,ci),(wo,co)] = w[co,ci,dy,wi-wo] if 0<=wi-wo<KW else 0.
    # (O(W^2) memory: fine at these widths; switch to shifted-slab matmuls or
    #  width-tiled bands before scaling W / channel counts.)
    wt = jnp.transpose(weight_oihw.astype(jnp.float32), (2, 3, 1, 0))  # (KH,KW,Cin,Cout)
    wi = jnp.arange(Wp)
    wo = jnp.arange(Wo)
    dx = wi[:, None] - wo[None, :]                       # (Wp, Wo)
    valid = (dx >= 0) & (dx < KW)
    dxc = jnp.clip(dx, 0, KW - 1)
    bfull = wt[:, dxc] * valid[None, :, :, None, None]   # (KH, Wp, Wo, Cin, Cout)
    B = jnp.transpose(bfull, (0, 1, 3, 2, 4)).reshape(K, L)
    B = jnp.pad(B, ((0, Kp - K), (0, 0))).astype(jnp.bfloat16)

    # ---------------------------- fused kernel ----------------------------------
    def kernel(lhs_ref, b_ref, o_ref):
        # conv: ONE MXU matmul (M=NR, K=Kp, N=L), bf16 in / f32 accumulate
        y = jnp.dot(lhs_ref[...], b_ref[...], preferred_element_type=jnp.float32)

        # Per-channel total over (rows, w).  Lane j holds (w = j // Cout,
        # c = j % Cout); a log2(Wo)-step strided circular roll+add tree over
        # lanes (XLU) sums over w per channel, then one row sum collapses rows.
        def channel_total(v):                        # (NR, L) -> (1, L)
            s = Cout
            for _ in range(wo_log2):
                v = v + pltpu.roll(v, s, axis=1)
                s *= 2
            return jnp.sum(v, axis=0, keepdims=True)

        # BatchNorm (training batch stats, affine=False), all stats math in f32.
        mean = channel_total(y) * (1.0 / M_total)                 # (1, L)
        c = y - mean
        var = channel_total(c * c) * (1.0 / M_total)              # (1, L)
        yn = c * jax.lax.rsqrt(var + EPS)                         # (NR, L)

        # MaxPool2d(3, stride=1, padding=1): separable max, whole slab at once.
        neg_inf = float("-inf")
        lane = jax.lax.broadcasted_iota(jnp.int32, (NR, L), 1)
        row = jax.lax.broadcasted_iota(jnp.int32, (NR, L), 0)
        h = row % Ho                                  # row index within its image
        # horizontal (w) pass: one w step == Cout lanes
        left = jnp.where(lane < Cout, neg_inf, pltpu.roll(yn, Cout, axis=1))
        right = jnp.where(lane >= (Wo - 1) * Cout, neg_inf,
                          pltpu.roll(yn, L - Cout, axis=1))
        rmax = jnp.maximum(jnp.maximum(yn, left), right)
        # vertical (h) pass: sublane roll; image seams are exactly the h==0 /
        # h==Ho-1 rows, so the cross-image wrap never contributes.
        up = jnp.where(h == 0, neg_inf, pltpu.roll(rmax, 1, axis=0))
        down = jnp.where(h == Ho - 1, neg_inf, pltpu.roll(rmax, NR - 1, axis=0))
        o_ref[...] = jnp.maximum(jnp.maximum(rmax, up), down)

    # Grid-less single block: all operands together are < 0.1 MiB of VMEM and
    # the kernel is launch-overhead bound; add a row-tile grid only when shapes
    # grow (see scaling notes at top).
    out2 = pl.pallas_call(
        kernel,
        out_shape=jax.ShapeDtypeStruct((NR, L), jnp.float32),
        in_specs=[
            pl.BlockSpec((NR, Kp), lambda: (0, 0)),
            pl.BlockSpec((Kp, L), lambda: (0, 0)),
        ],
        out_specs=pl.BlockSpec((NR, L), lambda: (0, 0)),
    )(lhs, B)

    # (N*Ho, Wo*Cout) -> NHWC -> NCHW (PyTorch output convention)
    out_nhwc = out2.reshape(N, Ho, Wo, Cout)
    return jnp.transpose(out_nhwc, (0, 3, 1, 2))


# ---------------- pure-JAX reference (for in-script correctness check) ----------
def ref_conv_block(x_nchw, weight_oihw, stride=1, padding=1):
    y = jax.lax.conv_general_dilated(
        x_nchw, weight_oihw, window_strides=(stride, stride),
        padding=[(padding, padding), (padding, padding)],
        dimension_numbers=("NCHW", "OIHW", "NCHW"))
    mean = jnp.mean(y, axis=(0, 2, 3), keepdims=True)
    var = jnp.mean((y - mean) ** 2, axis=(0, 2, 3), keepdims=True)
    y = (y - mean) * jax.lax.rsqrt(var + EPS)
    y = jax.lax.reduce_window(y, -jnp.inf, jax.lax.max,
                              (1, 1, 3, 3), (1, 1, 1, 1),
                              padding=((0, 0), (0, 0), (1, 1), (1, 1)))
    return y


if __name__ == "__main__":
    # Shapes consistent with ConvBlock(in_channels=4, out_channels=8, kernel_size=3,
    # stride=1, padding=1) applied to x of shape (2, 4, 16, 16).
    key = jax.random.PRNGKey(0)
    kx, kw = jax.random.split(key)

    N, Cin, H, W = 2, 4, 16, 16
    Cout, KH, KW = 8, 3, 3

    x = jax.random.normal(kx, (N, Cin, H, W), dtype=jnp.float32)
    fan_in = Cin * KH * KW
    bound = 1.0 / (fan_in ** 0.5)
    weight = jax.random.uniform(kw, (Cout, Cin, KH, KW), dtype=jnp.float32,
                                minval=-bound, maxval=bound)

    fwd = jax.jit(conv_block, static_argnames=("stride", "padding"))
    out = jax.block_until_ready(fwd(x, weight, stride=1, padding=1))

    assert out.shape == (N, Cout, H, W), out.shape
    assert bool(jnp.all(jnp.isfinite(out)))

    # tolerance covers bf16 matmul inputs (accumulation is f32; BN renormalizes)
    ref = jax.block_until_ready(ref_conv_block(x, weight, 1, 1))
    err = float(jnp.max(jnp.abs(out - ref)))
    assert err < 7.5e-2, f"max abs err vs reference too large: {err}"

    print("KERNEL_OK")
</pallas_src>

<mosaic_0001>
module attributes {stable_mosaic.version = 11 : i64} {
  func.func @kernel(%arg0: memref<32x256xbf16, #tpu.memory_space<vmem>>, %arg1: memref<256x128xbf16, #tpu.memory_space<vmem>>, %arg2: memref<32x128xf32, #tpu.memory_space<vmem>>) attributes {dimension_semantics = [], scalar_prefetch = 0 : i64, scratch_operands = 0 : i64, tpu.core_type = #tpu.core_type<tc>} {
    %c0 = arith.constant 0 : index
    %c0_0 = arith.constant 0 : index
    %0 = vector.load %arg0[%c0, %c0_0] : memref<32x256xbf16, #tpu.memory_space<vmem>>, vector<32x256xbf16>
    %c0_1 = arith.constant 0 : index
    %c0_2 = arith.constant 0 : index
    %1 = vector.load %arg1[%c0_1, %c0_2] : memref<256x128xbf16, #tpu.memory_space<vmem>>, vector<256x128xbf16>
    %cst = arith.constant dense<0.000000e+00> : vector<32x128xf32>
    %2 = tpu.matmul %0, %1, %cst {dimension_numbers = #tpu.dot_dimension_numbers<[1], [0], [0], [1], [0, 0, 1, 1], [], []>} : vector<32x256xbf16>, vector<256x128xbf16>, vector<32x128xf32> -> vector<32x128xf32>
    %c8_i32 = arith.constant 8 : i32
    %3 = tpu.dynamic_rotate %2 by %c8_i32 dim 1 : vector<32x128xf32>, i32 -> vector<32x128xf32>
    %4 = arith.addf %2, %3 : vector<32x128xf32>
    %c16_i32 = arith.constant 16 : i32
    %5 = tpu.dynamic_rotate %4 by %c16_i32 dim 1 : vector<32x128xf32>, i32 -> vector<32x128xf32>
    %6 = arith.addf %4, %5 : vector<32x128xf32>
    %c32_i32 = arith.constant 32 : i32
    %7 = tpu.dynamic_rotate %6 by %c32_i32 dim 1 : vector<32x128xf32>, i32 -> vector<32x128xf32>
    %8 = arith.addf %6, %7 : vector<32x128xf32>
    %c64_i32 = arith.constant 64 : i32
    %9 = tpu.dynamic_rotate %8 by %c64_i32 dim 1 : vector<32x128xf32>, i32 -> vector<32x128xf32>
    %10 = arith.addf %8, %9 : vector<32x128xf32>
    %cst_3 = arith.constant dense<0.000000e+00> : vector<128xf32>
    %11 = vector.multi_reduction <add>, %10, %cst_3 [0] : vector<32x128xf32> to vector<128xf32>
    %12 = vector.shape_cast %11 : vector<128xf32> to vector<1x128xf32>
    %cst_4 = arith.constant 0.001953125 : f32
    %13 = vector.broadcast %cst_4 : f32 to vector<1x128xf32>
    %14 = arith.mulf %12, %13 : vector<1x128xf32>
    %15 = vector.broadcast %14 : vector<1x128xf32> to vector<32x128xf32>
    %16 = arith.subf %2, %15 : vector<32x128xf32>
    %17 = arith.mulf %16, %16 : vector<32x128xf32>
    %c8_i32_5 = arith.constant 8 : i32
    %18 = tpu.dynamic_rotate %17 by %c8_i32_5 dim 1 : vector<32x128xf32>, i32 -> vector<32x128xf32>
    %19 = arith.addf %17, %18 : vector<32x128xf32>
    %c16_i32_6 = arith.constant 16 : i32
    %20 = tpu.dynamic_rotate %19 by %c16_i32_6 dim 1 : vector<32x128xf32>, i32 -> vector<32x128xf32>
    %21 = arith.addf %19, %20 : vector<32x128xf32>
    %c32_i32_7 = arith.constant 32 : i32
    %22 = tpu.dynamic_rotate %21 by %c32_i32_7 dim 1 : vector<32x128xf32>, i32 -> vector<32x128xf32>
    %23 = arith.addf %21, %22 : vector<32x128xf32>
    %c64_i32_8 = arith.constant 64 : i32
    %24 = tpu.dynamic_rotate %23 by %c64_i32_8 dim 1 : vector<32x128xf32>, i32 -> vector<32x128xf32>
    %25 = arith.addf %23, %24 : vector<32x128xf32>
    %cst_9 = arith.constant dense<0.000000e+00> : vector<128xf32>
    %26 = vector.multi_reduction <add>, %25, %cst_9 [0] : vector<32x128xf32> to vector<128xf32>
    %27 = vector.shape_cast %26 : vector<128xf32> to vector<1x128xf32>
    %cst_10 = arith.constant 0.001953125 : f32
    %28 = vector.broadcast %cst_10 : f32 to vector<1x128xf32>
    %29 = arith.mulf %27, %28 : vector<1x128xf32>
    %cst_11 = arith.constant 9.99999974E-6 : f32
    %30 = vector.broadcast %cst_11 : f32 to vector<1x128xf32>
    %31 = arith.addf %29, %30 : vector<1x128xf32>
    %32 = math.rsqrt %31 : vector<1x128xf32>
    %33 = vector.broadcast %32 : vector<1x128xf32> to vector<32x128xf32>
    %34 = arith.mulf %16, %33 : vector<32x128xf32>
    %35 = tpu.iota {dimensions = array<i32: 1>} : vector<32x128xi32>
    %36 = tpu.iota {dimensions = array<i32: 0>} : vector<32x128xi32>
    %c16_i32_12 = arith.constant 16 : i32
    %c0_i32 = arith.constant 0 : i32
    %37 = arith.cmpi eq, %c16_i32_12, %c0_i32 : i32
    %c1_i32 = arith.constant 1 : i32
    %38 = arith.select %37, %c1_i32, %c16_i32_12 : i32
    %39 = vector.broadcast %38 : i32 to vector<32x128xi32>
    %40 = arith.remsi %36, %39 : vector<32x128xi32>
    %c0_i32_13 = arith.constant 0 : i32
    %41 = vector.broadcast %c0_i32_13 : i32 to vector<32x128xi32>
    %42 = arith.cmpi ne, %40, %41 : vector<32x128xi32>
    %c0_i32_14 = arith.constant 0 : i32
    %43 = vector.broadcast %c0_i32_14 : i32 to vector<32x128xi32>
    %44 = arith.cmpi slt, %40, %43 : vector<32x128xi32>
    %c0_i32_15 = arith.constant 0 : i32
    %45 = arith.cmpi slt, %38, %c0_i32_15 : i32
    %46 = vector.broadcast %45 : i1 to vector<32x128xi1>
    %47 = vector.broadcast %46 : vector<32x128xi1> to vector<32x128xi1>
    %48 = arith.xori %44, %47 : vector<32x128xi1>
    %49 = arith.andi %48, %42 : vector<32x128xi1>
    %50 = vector.broadcast %38 : i32 to vector<32x128xi32>
    %51 = arith.addi %40, %50 : vector<32x128xi32>
    %52 = arith.select %49, %51, %40 : vector<32x128xi1>, vector<32x128xi32>
    %c8_i32_16 = arith.constant 8 : i32
    %53 = vector.broadcast %c8_i32_16 : i32 to vector<32x128xi32>
    %54 = arith.cmpi slt, %35, %53 : vector<32x128xi32>
    %c8_i32_17 = arith.constant 8 : i32
    %55 = tpu.dynamic_rotate %34 by %c8_i32_17 dim 1 : vector<32x128xf32>, i32 -> vector<32x128xf32>
    %cst_18 = arith.constant 0xFF800000 : f32
    %56 = vector.broadcast %cst_18 : f32 to vector<32x128xf32>
    %57 = arith.select %54, %56, %55 : vector<32x128xi1>, vector<32x128xf32>
    %c120_i32 = arith.constant 120 : i32
    %58 = vector.broadcast %c120_i32 : i32 to vector<32x128xi32>
    %59 = arith.cmpi sge, %35, %58 : vector<32x128xi32>
    %c120_i32_19 = arith.constant 120 : i32
    %60 = tpu.dynamic_rotate %34 by %c120_i32_19 dim 1 : vector<32x128xf32>, i32 -> vector<32x128xf32>
    %cst_20 = arith.constant 0xFF800000 : f32
    %61 = vector.broadcast %cst_20 : f32 to vector<32x128xf32>
    %62 = arith.select %59, %61, %60 : vector<32x128xi1>, vector<32x128xf32>
    %63 = arith.maximumf %34, %57 : vector<32x128xf32>
    %64 = arith.maximumf %63, %62 : vector<32x128xf32>
    %c0_i32_21 = arith.constant 0 : i32
    %65 = vector.broadcast %c0_i32_21 : i32 to vector<32x128xi32>
    %66 = arith.cmpi eq, %52, %65 : vector<32x128xi32>
    %c1_i32_22 = arith.constant 1 : i32
    %67 = tpu.dynamic_rotate %64 by %c1_i32_22 dim 0 : vector<32x128xf32>, i32 -> vector<32x128xf32>
    %cst_23 = arith.constant 0xFF800000 : f32
    %68 = vector.broadcast %cst_23 : f32 to vector<32x128xf32>
    %69 = arith.select %66, %68, %67 : vector<32x128xi1>, vector<32x128xf32>
    %c15_i32 = arith.constant 15 : i32
    %70 = vector.broadcast %c15_i32 : i32 to vector<32x128xi32>
    %71 = arith.cmpi eq, %52, %70 : vector<32x128xi32>
    %c31_i32 = arith.constant 31 : i32
    %72 = tpu.dynamic_rotate %64 by %c31_i32 dim 0 : vector<32x128xf32>, i32 -> vector<32x128xf32>
    %cst_24 = arith.constant 0xFF800000 : f32
    %73 = vector.broadcast %cst_24 : f32 to vector<32x128xf32>
    %74 = arith.select %71, %73, %72 : vector<32x128xi1>, vector<32x128xf32>
    %75 = arith.maximumf %64, %69 : vector<32x128xf32>
    %76 = arith.maximumf %75, %74 : vector<32x128xf32>
    %c0_25 = arith.constant 0 : index
    %c0_26 = arith.constant 0 : index
    %77 = vector.load %arg2[%c0_25, %c0_26] : memref<32x128xf32, #tpu.memory_space<vmem>>, vector<32x128xf32>
    tpu.vector_store %arg2[%c0_25, %c0_26], %76 {strides = array<i32>} : memref<32x128xf32, #tpu.memory_space<vmem>>, vector<32x128xf32>,
    return
  }
}

</mosaic_0001>

<bundles_post_ra>
// kernel: conv_block.1
= control target key start
LH: loop header
LB: loop body
LE: loop exit
PB: predicated region body
PF: predicated region fallthrough
CT: control target
= control target key end

     0   :  { %s577_s21 = smov 32   ;;  %s578_s22 = smov 64   ;;  %s779_s1 = inlined_call_operand.vmem [shape: bf16[256,128], index: 1, kind: input, shape index: {}]   ;;  %s780_s0 = inlined_call_operand.vmem [shape: bf16[32,256], index: 0, kind: input, shape index: {}]   ;;  %s781_s2 = inlined_call_operand.vmem [shape: f32[32,128], index: 2, kind: output, shape index: {}]  }
   0x1   :  { %v551_v0 = vld [vmem:[%s779_s1 + $0x40] sm:$0xff]   ;;  %v553_v2 = vld [vmem:[%s779_s1 + $0x48] sm:$0xff]   ;;  %v555_v4 = vld [vmem:[%s779_s1 + $0x50] sm:$0xff]   ;;  %s579_s23 = smov 120  }
   0x2   :  { %v552_v1 = vld [vmem:[%s779_s1] sm:$0xff]   ;;  %502 = vmatprep.subr.bf16.mxu0 %v551_v0  ;;  %530 = vmatprep.subr.bf16.mxu1 %v551_v0  ;;  %v554_v3 = vld [vmem:[%s779_s1 + $0x8] sm:$0xff]   ;;  %v556_v5 = vld [vmem:[%s779_s1 + $0x10] sm:$0xff]  }
   0x3   :  { %503 = vmatpush3.bf16.msra.mxu0 %v552_v1  ;;  %538 = vmatpush3.bf16.msra.mxu1 %v552_v1  ;;  %v557_v6 = vld [vmem:[%s779_s1 + $0x58] sm:$0xff]   ;;  %v559_v8 = vld [vmem:[%s779_s1 + $0x60] sm:$0xff]   ;;  %v561_v10 = vld [vmem:[%s779_s1 + $0x68] sm:$0xff]  }
   0x4   :  { %504 = vmatprep.subr.bf16.mxu0 %v553_v2  ;;  %531 = vmatprep.subr.bf16.mxu1 %v553_v2  ;;  %v558_v7 = vld [vmem:[%s779_s1 + $0x18] sm:$0xff]   ;;  %v560_v9 = vld [vmem:[%s779_s1 + $0x20] sm:$0xff]   ;;  %v562_v13 = vld [vmem:[%s779_s1 + $0x28] sm:$0xff]  }
   0x5   :  { %v569_v11 = vld [vmem:[%s780_s0 + $0x4] ss:$8 sps:$4 sm:$0xff]   ;;  %v572_v12 = vld [vmem:[%s780_s0 + $0x14] ss:$8 sps:$4 sm:$0xff]   ;;  %v567_v18 = vld [vmem:[%s780_s0] ss:$8 sps:$4 sm:$0xff]  }
   0x6   :  { %v563_v14 = vld [vmem:[%s779_s1 + $0x70] sm:$0xff]   ;;  %196 = vmatprep.mubr.bf16.mxu0 %v569_v11  ;;  %204 = vmatprep.mubr.bf16.mxu1 %v572_v12  ;;  %v565_v16 = vld [vmem:[%s779_s1 + $0x78] sm:$0xff]  }
   0x7   :  { %505 = vmatpush3.bf16.msra.mxu0 %v554_v3  ;;  %539 = vmatpush3.bf16.msra.mxu1 %v554_v3  ;;  %v564_v15 = vld [vmem:[%s779_s1 + $0x30] sm:$0xff]   ;;  %v566_v17 = vld [vmem:[%s779_s1 + $0x38] sm:$0xff]   ;;  %s576_s1 = smov 16  }
   0x8   :  { %506 = vmatprep.subr.bf16.mxu0 %v555_v4  ;;  %532 = vmatprep.subr.bf16.mxu1 %v555_v4  ;;  %v570_v19 = vld [vmem:[%s780_s0 + $0x10] ss:$8 sps:$4 sm:$0xff]   ;;  %s575_s0 = smov 8  }
   0xb   :  { %507 = vmatpush3.bf16.msra.mxu0 %v556_v5  ;;  %540 = vmatpush3.bf16.msra.mxu1 %v556_v5 }
   0xc   :  { %508 = vmatprep.subr.bf16.mxu0 %v557_v6  ;;  %533 = vmatprep.subr.bf16.mxu1 %v557_v6 }
   0xf   :  { %509 = vmatpush3.bf16.msra.mxu0 %v558_v7  ;;  %541 = vmatpush3.bf16.msra.mxu1 %v558_v7 }
  0x10   :  { %510 = vmatprep.subr.bf16.mxu0 %v559_v8  ;;  %534 = vmatprep.subr.bf16.mxu1 %v559_v8 }
  0x13   :  { %511 = vmatpush3.bf16.msra.mxu0 %v560_v9  ;;  %542 = vmatpush3.bf16.msra.mxu1 %v560_v9 }
  0x14   :  { %512 = vmatprep.subr.bf16.mxu0 %v561_v10  ;;  %535 = vmatprep.subr.bf16.mxu1 %v561_v10 }
  0x17   :  { %513 = vmatpush3.bf16.msra.mxu0 %v562_v13  ;;  %543 = vmatpush3.bf16.msra.mxu1 %v562_v13 }
  0x18   :  { %514 = vmatprep.subr.bf16.mxu0 %v563_v14  ;;  %536 = vmatprep.subr.bf16.mxu1 %v563_v14 }
  0x1b   :  { %515 = vmatpush3.bf16.msra.mxu0 %v564_v15  ;;  %544 = vmatpush3.bf16.msra.mxu1 %v564_v15 }
  0x1c   :  { %516 = vmatprep.subr.bf16.mxu0 %v565_v16  ;;  %537 = vmatprep.subr.bf16.mxu1 %v565_v16 }
  0x1f   :  { %517 = vmatpush3.bf16.msra.mxu0 %v566_v17  ;;  %545 = vmatpush3.bf16.msra.mxu1 %v566_v17 }
  0x22   :  { %197 = vmatmul.mubr.bf16.vlgmr.msra.gmra.mrb[0].mxu0 %v567_v18  ;;  %205 = vmatmul.mubr.bf16.vlgmr.msra.gmra.mrb[0].mxu1 %v570_v19 }
  0xf5   :  { %v518_v20 = vpop.f32.mrb[0].mxu0  ;;  %v524_v21 = vpop.f32.mrb[0].mxu1 }
  0xf6   :  { %v519_v22 = vpop.f32.mrb[1].mxu0  ;;  %v525_v23 = vpop.f32.mrb[1].mxu1 }
  0xf7   :  { %v655_v24 = vadd.f32 %v519_v22, %v518_v20  ;;  %v657_v25 = vadd.f32 %v525_v23, %v524_v21  ;;  %v521_v26 = vpop.f32.mrb[2].mxu0  ;;  %v527_v27 = vpop.f32.mrb[2].mxu1 }
  0xf8   :  { %v522_v28 = vpop.f32.mrb[3].mxu0  ;;  %v528_v29 = vpop.f32.mrb[3].mxu1 }
  0xf9   :  { %v659_v30 = vadd.f32 %v522_v28, %v521_v26  ;;  %v661_v31 = vadd.f32 %v528_v29, %v527_v27  ;;  %217 = vrot.lane.b32.xlu1 %v657_v25, %s575_s0  ;;  %213 = vrot.lane.b32.xlu0 %v655_v24, %s575_s0 }
  0xfd   :  { %219 = vrot.lane.b32.xlu1 %v661_v31, %s575_s0  ;;  %215 = vrot.lane.b32.xlu0 %v659_v30, %s575_s0 }
 0x16b   :  { %v218_v32 = vpop.permute.xlu1 %217  ;;  %v214_v33 = vpop.permute.xlu0 %213 }
 0x16c   :  { %v221_v34 = vadd.f32 %v655_v24, %v214_v33  ;;  %v223_v36 = vadd.f32 %v657_v25, %v218_v32 }
 0x16e   :  { %225 = vrot.lane.b32.xlu0 %v221_v34, %s576_s1 }
 0x16f   :  { %v216_v35 = vpop.permute.xlu0 %215  ;;  %v220_v38 = vpop.permute.xlu1 %219 }
 0x170   :  { %v222_v37 = vadd.f32 %v659_v30, %v216_v35  ;;  %v224_v39 = vadd.f32 %v661_v31, %v220_v38 }
 0x172   :  { %229 = vrot.lane.b32.xlu0 %v223_v36, %s576_s1  ;;  %227 = vrot.lane.b32.xlu1 %v222_v37, %s576_s1 }
 0x176   :  { %231 = vrot.lane.b32.xlu1 %v224_v39, %s576_s1 }
 0x1e0   :  { %v226_v40 = vpop.permute.xlu0 %225 }
 0x1e1   :  { %v233_v41 = vadd.f32 %v226_v40, %v221_v34 }
 0x1e3   :  { %237 = vrot.lane.b32.xlu0 %v233_v41, %s577_s21 }
 0x1e4   :  { %v228_v42 = vpop.permute.xlu1 %227  ;;  %v230_v43 = vpop.permute.xlu0 %229 }
 0x1e5   :  { %v234_v44 = vadd.f32 %v228_v42, %v222_v37  ;;  %v235_v45 = vadd.f32 %v230_v43, %v223_v36 }
 0x1e7   :  { %239 = vrot.lane.b32.xlu1 %v234_v44, %s577_s21  ;;  %241 = vrot.lane.b32.xlu0 %v235_v45, %s577_s21 }
 0x1e8   :  { %v232_v46 = vpop.permute.xlu1 %231 }
 0x1e9   :  { %v236_v47 = vadd.f32 %v232_v46, %v224_v39 }
 0x1eb   :  { %243 = vrot.lane.b32.xlu1 %v236_v47, %s577_s21 }
 0x255   :  { %v238_v48 = vpop.permute.xlu0 %237 }
 0x256   :  { %v245_v49 = vadd.f32 %v238_v48, %v233_v41 }
 0x258   :  { %249 = vrot.lane.b32.xlu0 %v245_v49, %s578_s22 }
 0x259   :  { %v240_v50 = vpop.permute.xlu1 %239  ;;  %v242_v51 = vpop.permute.xlu0 %241 }
 0x25a   :  { %v246_v52 = vadd.f32 %v240_v50, %v234_v44  ;;  %v247_v53 = vadd.f32 %v242_v51, %v235_v45 }
 0x25c   :  { %251 = vrot.lane.b32.xlu1 %v246_v52, %s578_s22  ;;  %253 = vrot.lane.b32.xlu0 %v247_v53, %s578_s22 }
 0x25d   :  { %v244_v54 = vpop.permute.xlu1 %243 }
 0x25e   :  { %v248_v55 = vadd.f32 %v244_v54, %v236_v47 }
 0x260   :  { %255 = vrot.lane.b32.xlu1 %v248_v55, %s578_s22 }
 0x2ca   :  { %v250_v56 = vpop.permute.xlu0 %249 }
 0x2cb   :  { %v257_v59 = vadd.f32 %v250_v56, %v245_v49 }
 0x2ce   :  { %v252_v57 = vpop.permute.xlu1 %251  ;;  %v254_v58 = vpop.permute.xlu0 %253 }
 0x2cf   :  { %v258_v60 = vadd.f32 %v252_v57, %v246_v52  ;;  %v259_v62 = vadd.f32 %v254_v58, %v247_v53 }
 0x2d1   :  { %v261_v61 = vadd.f32 %v258_v60, %v257_v59 }
 0x2d2   :  { %v256_v63 = vpop.permute.xlu1 %255 }
 0x2d3   :  { %v262_v0 = vadd.f32 %v261_v61, %v259_v62  ;;  %v260_v1 = vadd.f32 %v256_v63, %v248_v55 }
 0x2d5   :  { %v263_v2 = vadd.f32 %v262_v0, %v260_v1 }
 0x2d7   :  { %v264_v3 = vrot.slane %v263_v2, 4 }
 0x2d9   :  { %v265_v4 = vadd.f32 %v264_v3, %v263_v2  ;;  %v343_v2 = vlaneseq }
 0x2db   :  { %v266_v5 = vrot.slane %v265_v4, 2  ;;  %v344_v3 = vand.u32 127, %v343_v2 }
 0x2dd   :  { %v267_v6 = vadd.f32 %v266_v5, %v265_v4  ;;  %vm398_vm0 = vcmp.lt.s32.totalorder %v344_v3, 8  ;;  %vm411_vm1 = vcmp.ge.s32.totalorder %v344_v3, 120 }
 0x2df   :  { %v268_v7 = vrot.slane %v267_v6, 1 }
 0x2e1   :  { %v269_v8 = vadd.f32 %v268_v7, %v267_v6  ;;  %v346_v6 = vshrl.u32 %v343_v2, 7 }
 0x2e3   :  { %v270_v9 = vmul.f32 0.001953125, %v269_v8  ;;  %vm440_vm2 = vcmp.lt.s32.totalorder %v346_v6, 1  ;;  %vm457_vm6 = vcmp.lt.s32.totalorder %v346_v6, 7 }
 0x2e5   :  { %v688_v10 = vsub.f32 %v659_v30, %v270_v9  ;;  %v691_v11 = vsub.f32 %v655_v24, %v270_v9  ;;  %v698_v14 = vsub.f32 %v661_v31, %v270_v9  ;;  %v701_v15 = vsub.f32 %v657_v25, %v270_v9 }
 0x2e7   :  { %v276_v12 = vmul.f32 %v688_v10, %v688_v10  ;;  %v275_v13 = vmul.f32 %v691_v11, %v691_v11  ;;  %v278_v16 = vmul.f32 %v698_v14, %v698_v14  ;;  %v277_v17 = vmul.f32 %v701_v15, %v701_v15 }
 0x2e9   :  { %281 = vrot.lane.b32.xlu1 %v276_v12, %s575_s0  ;;  %279 = vrot.lane.b32.xlu0 %v275_v13, %s575_s0 }
 0x2ed   :  { %285 = vrot.lane.b32.xlu1 %v278_v16, %s575_s0  ;;  %283 = vrot.lane.b32.xlu0 %v277_v17, %s575_s0 }
 0x35b   :  { %v282_v18 = vpop.permute.xlu1 %281  ;;  %v280_v19 = vpop.permute.xlu0 %279 }
 0x35c   :  { %v288_v20 = vadd.f32 %v282_v18, %v276_v12  ;;  %v287_v21 = vadd.f32 %v280_v19, %v275_v13  ;;  %v348_v12 = vadd.s32 16, %v346_v6 }
 0x35e   :  { %293 = vrot.lane.b32.xlu1 %v288_v20, %s576_s1  ;;  %291 = vrot.lane.b32.xlu0 %v287_v21, %s576_s1 }
 0x35f   :  { %v286_v22 = vpop.permute.xlu1 %285  ;;  %v284_v23 = vpop.permute.xlu0 %283 }
 0x360   :  { %v290_v24 = vadd.f32 %v286_v22, %v278_v16  ;;  %v289_v25 = vadd.f32 %v284_v23, %v277_v17  ;;  %v347_v17 = vadd.s32 8, %v346_v6 }
 0x362   :  { %297 = vrot.lane.b32.xlu1 %v290_v24, %s576_s1  ;;  %295 = vrot.lane.b32.xlu0 %v289_v25, %s576_s1 }
 0x3d0   :  { %v294_v26 = vpop.permute.xlu1 %293  ;;  %v292_v27 = vpop.permute.xlu0 %291 }
 0x3d1   :  { %v300_v28 = vadd.f32 %v294_v26, %v288_v20  ;;  %v299_v29 = vadd.f32 %v292_v27, %v287_v21  ;;  %v368_v26 = vand.u32 15, %v348_v12 }
 0x3d3   :  { %305 = vrot.lane.b32.xlu1 %v300_v28, %s577_s21  ;;  %303 = vrot.lane.b32.xlu0 %v299_v29, %s577_s21  ;;  %vm744_vm5 = vcmp.eq.s32.totalorder %v368_v26, 0 }
 0x3d4   :  { %v298_v30 = vpop.permute.xlu1 %297  ;;  %v296_v31 = vpop.permute.xlu0 %295 }
 0x3d5   :  { %v302_v32 = vadd.f32 %v298_v30, %v290_v24  ;;  %v301_v33 = vadd.f32 %v296_v31, %v289_v25  ;;  %v354_v24 = vand.u32 15, %v346_v6 }
 0x3d7   :  { %309 = vrot.lane.b32.xlu1 %v302_v32, %s577_s21  ;;  %307 = vrot.lane.b32.xlu0 %v301_v33, %s577_s21  ;;  %vm735_vm3 = vcmp.eq.s32.totalorder %v354_v24, 0 }
 0x445   :  { %v306_v34 = vpop.permute.xlu1 %305  ;;  %v304_v35 = vpop.permute.xlu0 %303 }
 0x446   :  { %v312_v36 = vadd.f32 %v306_v34, %v300_v28  ;;  %v311_v37 = vadd.f32 %v304_v35, %v299_v29  ;;  %v361_v34 = vand.u32 15, %v347_v17 }
 0x448   :  { %317 = vrot.lane.b32.xlu1 %v312_v36, %s578_s22  ;;  %315 = vrot.lane.b32.xlu0 %v311_v37, %s578_s22  ;;  %vm748_vm7 = vcmp.eq.s32.totalorder %v361_v34, 15 }
 0x449   :  { %v310_v38 = vpop.permute.xlu1 %309  ;;  %v308_v39 = vpop.permute.xlu0 %307 }
 0x44a   :  { %v314_v40 = vadd.f32 %v310_v38, %v302_v32  ;;  %v313_v41 = vadd.f32 %v308_v39, %v301_v33 }
 0x44c   :  { %321 = vrot.lane.b32.xlu1 %v314_v40, %s578_s22  ;;  %319 = vrot.lane.b32.xlu0 %v313_v41, %s578_s22 }
 0x4ba   :  { %v318_v42 = vpop.permute.xlu1 %317  ;;  %v316_v43 = vpop.permute.xlu0 %315 }
 0x4bb   :  { %v324_v44 = vadd.f32 %v318_v42, %v312_v36  ;;  %v323_v45 = vadd.f32 %v316_v43, %v311_v37 }
 0x4bd   :  { %v327_v48 = vadd.f32 %v324_v44, %v323_v45 }
 0x4be   :  { %v322_v46 = vpop.permute.xlu1 %321  ;;  %v320_v47 = vpop.permute.xlu0 %319 }
 0x4bf   :  { %v325_v49 = vadd.f32 %v320_v47, %v313_v41  ;;  %v326_v50 = vadd.f32 %v322_v46, %v314_v40 }
 0x4c1   :  { %v328_v51 = vadd.f32 %v327_v48, %v325_v49 }
 0x4c3   :  { %v329_v52 = vadd.f32 %v328_v51, %v326_v50 }
 0x4c5   :  { %v330_v53 = vrot.slane %v329_v52, 4 }
 0x4c7   :  { %v331_v54 = vadd.f32 %v330_v53, %v329_v52 }
 0x4c9   :  { %v332_v55 = vrot.slane %v331_v54, 2 }
 0x4cb   :  { %v333_v56 = vadd.f32 %v332_v55, %v331_v54 }
 0x4cd   :  { %v334_v57 = vrot.slane %v333_v56, 1 }
 0x4cf   :  { %v335_v58 = vadd.f32 %v334_v57, %v333_v56 }
 0x4d1   :  { %v336_v59 = vmul.f32 0.001953125, %v335_v58 }
 0x4d3   :  { %v337_v60 = vadd.f32 1e-05, %v336_v59 }
 0x4d5   :  { %573 = vrsqrt.f32 %v337_v60 }
 0x4df   :  { %v574_v61 = vpop.eup %573 }
 0x4e0   :  { %v340_v62 = vmul.f32 %v574_v61, %v688_v10  ;;  %v339_v63 = vmul.f32 %v574_v61, %v691_v11  ;;  %v342_v0 = vmul.f32 %v574_v61, %v698_v14  ;;  %v341_v1 = vmul.f32 %v574_v61, %v701_v15 }
 0x4e1   :  { %v349_v11 = vadd.s32 24, %v346_v6 }
 0x4e2   :  { %401 = vrot.lane.b32.xlu1 %v340_v62, %s575_s0  ;;  %399 = vrot.lane.b32.xlu0 %v339_v63, %s575_s0 }
 0x4e3   :  { %v375_v25 = vand.u32 15, %v349_v11 }
 0x4e5   :  { %vm740_vm4 = vcmp.eq.s32.totalorder %v375_v25, 15 }
 0x4e6   :  { %405 = vrot.lane.b32.xlu1 %v342_v0, %s575_s0  ;;  %403 = vrot.lane.b32.xlu0 %v341_v1, %s575_s0 }
 0x4ea   :  { %414 = vrot.lane.b32.xlu1 %v340_v62, %s579_s23  ;;  %412 = vrot.lane.b32.xlu0 %v339_v63, %s579_s23 }
 0x4ee   :  { %418 = vrot.lane.b32.xlu1 %v342_v0, %s579_s23  ;;  %416 = vrot.lane.b32.xlu0 %v341_v1, %s579_s23 }
 0x554   :  { %v402_v4 = vpop.permute.xlu1 %401  ;;  %v400_v5 = vpop.permute.xlu0 %399 }
 0x555   :  { %v408_v9 = vsel %vm398_vm0, -inf, %v402_v4  ;;  %v407_v10 = vsel %vm398_vm0, -inf, %v400_v5 }
 0x556   :  { %v425_v13 = vmax.f32 %v340_v62, %v408_v9  ;;  %v424_v14 = vmax.f32 %v339_v63, %v407_v10 }
 0x558   :  { %v406_v7 = vpop.permute.xlu1 %405  ;;  %v404_v8 = vpop.permute.xlu0 %403 }
 0x559   :  { %v410_v18 = vsel %vm398_vm0, -inf, %v406_v7  ;;  %v409_v19 = vsel %vm398_vm0, -inf, %v404_v8 }
 0x55a   :  { %v427_v27 = vmax.f32 %v342_v0, %v410_v18  ;;  %v426_v28 = vmax.f32 %v341_v1, %v409_v19 }
 0x55c   :  { %v415_v15 = vpop.permute.xlu1 %414  ;;  %v413_v16 = vpop.permute.xlu0 %412 }
 0x55d   :  { %v421_v20 = vsel %vm411_vm1, -inf, %v415_v15  ;;  %v420_v21 = vsel %vm411_vm1, -inf, %v413_v16 }
 0x55e   :  { %v429_v22 = vmax.f32 %v425_v13, %v421_v20  ;;  %v428_v23 = vmax.f32 %v424_v14, %v420_v21 }
 0x560   :  { %v437_v29 = vrot.slane %v429_v22, 7  ;;  %v436_v30 = vrot.slane %v428_v23, 7  ;;  %v419_v31 = vpop.permute.xlu1 %418  ;;  %v417_v32 = vpop.permute.xlu0 %416  ;;  %v453_v40 = vrot.slane %v428_v23, 1  ;;  %v454_v47 = vrot.slane %v429_v22, 1 }
 0x561   :  { %v423_v33 = vsel %vm411_vm1, -inf, %v419_v31  ;;  %v422_v35 = vsel %vm411_vm1, -inf, %v417_v32 }
 0x562   :  { %v431_v37 = vmax.f32 %v427_v27, %v423_v33  ;;  %v430_v38 = vmax.f32 %v426_v28, %v422_v35  ;;  %v443_v39 = vsel %vm440_vm2, %v436_v30, %v437_v29  ;;  %v460_v61 = vsel %vm457_vm6, %v453_v40, %v454_v47 }
 0x563   :  { %v467_v53 = vmax.f32 %v429_v22, %v443_v39 }
 0x564   :  { %v439_v43 = vrot.slane %v431_v37, 7  ;;  %v456_v44 = vrot.slane %v431_v37, 1  ;;  %v438_v45 = vrot.slane %v430_v38, 7  ;;  %v455_v46 = vrot.slane %v430_v38, 1 }
 0x566   :  { %v444_v49 = vsel %vm440_vm2, %v439_v43, %v436_v30  ;;  %v461_v50 = vsel %vm457_vm6, %v456_v44, %v453_v40  ;;  %v441_v51 = vsel %vm440_vm2, %v438_v45, %v439_v43  ;;  %v442_v52 = vsel %vm440_vm2, %v437_v29, %v438_v45 }
 0x567   :  { %v445_v54 = vsel %vm735_vm3, -inf, %v444_v49  ;;  %v465_v55 = vsel %vm740_vm4, -inf, %v461_v50  ;;  %v447_v56 = vsel %vm744_vm5, -inf, %v442_v52  ;;  %v459_v58 = vsel %vm457_vm6, %v454_v47, %v455_v46 }
 0x568   :  { %v466_v57 = vmax.f32 %v428_v23, %v445_v54  ;;  %v468_v59 = vmax.f32 %v430_v38, %v447_v56  ;;  %v469_v60 = vmax.f32 %v431_v37, %v441_v51  ;;  %v458_v62 = vsel %vm457_vm6, %v455_v46, %v456_v44 }
 0x569   :  { %v463_v63 = vsel %vm748_vm7, -inf, %v459_v58 }
 0x56a   :  { %v470_v0 = vmax.f32 %v466_v57, %v460_v61  ;;  %v471_v1 = vmax.f32 %v467_v53, %v463_v63  ;;  %v472_v2 = vmax.f32 %v468_v59, %v458_v62  ;;  %v473_v3 = vmax.f32 %v469_v60, %v465_v55 }
 0x56c   :  { %474 = vst [vmem:[%s781_s2] sm:$0xff] %v470_v0  ;;  %475 = vst [vmem:[%s781_s2 + $0x8] sm:$0xff] %v471_v1 }
 0x56d   :  { %476 = vst [vmem:[%s781_s2 + $0x10] sm:$0xff] %v472_v2  ;;  %477 = vst [vmem:[%s781_s2 + $0x18] sm:$0xff] %v473_v3 }

</bundles_post_ra>
